<compile_context>
chip_gen: v7x
topology: tpu7x:2x2x1
jax: 0.10.0
libtpu: 0.0.40
codegen_flags: <defaults>
</compile_context>

<pallas_src>
import functools

import jax
import jax.numpy as jnp
from jax.experimental import pallas as pl
from jax.experimental.pallas import tpu as pltpu


def _round_up(x, m):
    return ((x + m - 1) // m) * m


def _make_flow_kernel(k):
    """Kernel applying k composed RealNVP_cond_t flows to one (dp, TM) lane-dense tile."""

    def kernel(x_ref, c1_ref, c3_ref,
               wa1_ref, w2_ref, b2_ref,
               wa3_ref, w4_ref, b4_ref,
               out_ref):
        x = x_ref[0]                    # (dp, TM)  rows [:dim_1]=lower, [dim_1:dim]=upper
        c1 = c1_ref[0]                  # (k, Hh, 1)  per-batch  obs @ wb1 + b1 (as columns)
        c3 = c3_ref[0]                  # (k, Hh, 1)  per-batch  obs @ wb3 + b3

        for kk in range(k):             # k is small & static -> unrolled
            # t1(cat([lower, obs])) : Linear -> tanh -> Linear   (obs branch precomputed)
            h1 = jnp.tanh(
                jnp.dot(wa1_ref[kk], x, preferred_element_type=jnp.float32) + c1[kk])
            # upper += t1   (w2_t / b2_t are zero outside the upper rows)
            x = x + jnp.dot(w2_ref[kk], h1, preferred_element_type=jnp.float32) + b2_ref[kk]

            # t2(cat([upper, obs])) : Linear -> tanh -> Linear
            h2 = jnp.tanh(
                jnp.dot(wa3_ref[kk], x, preferred_element_type=jnp.float32) + c3[kk])
            # lower += t2   (w4_t / b4_t are zero outside the lower rows)
            x = x + jnp.dot(w4_ref[kk], h2, preferred_element_type=jnp.float32) + b4_ref[kk]

        out_ref[0] = x

    return kernel


def init_params(key, k, dim, hidden_dim, obser_dim):
    """Parameters matching zero_initialization(0.1): W ~ N(0, 0.1), b = 0.

    Weights are stored (in, out), split at the lower/obs concat boundary.
    """
    dim_1 = dim - dim // 2
    dim_2 = dim // 2
    ks = jax.random.split(key, 6)
    std = 0.1
    return {
        # t1: (dim_1 + obser_dim) -> hidden -> dim_2
        "wa1": jax.random.normal(ks[0], (k, dim_1, hidden_dim), jnp.float32) * std,
        "wb1": jax.random.normal(ks[1], (k, obser_dim, hidden_dim), jnp.float32) * std,
        "b1": jnp.zeros((k, 1, hidden_dim), jnp.float32),
        "w2": jax.random.normal(ks[2], (k, hidden_dim, dim_2), jnp.float32) * std,
        "b2": jnp.zeros((k, 1, dim_2), jnp.float32),
        # t2: (dim_2 + obser_dim) -> hidden -> dim_1
        "wa3": jax.random.normal(ks[3], (k, dim_2, hidden_dim), jnp.float32) * std,
        "wb3": jax.random.normal(ks[4], (k, obser_dim, hidden_dim), jnp.float32) * std,
        "b3": jnp.zeros((k, 1, hidden_dim), jnp.float32),
        "w4": jax.random.normal(ks[5], (k, hidden_dim, dim_1), jnp.float32) * std,
        "b4": jnp.zeros((k, 1, dim_1), jnp.float32),
    }


def prepare_params(params, *, k, dim, hidden_dim):
    """One-time weight prep: transpose + zero-embed into kernel-layout matrices.

    Hoisted out of the per-time-step forward (a particle filter calls forward every step).
    Only the hidden axis is padded, and only to the 8-row sublane granule.
    """
    dim_1 = dim - dim // 2
    dp = _round_up(dim, 8)
    Hh = _round_up(hidden_dim, 8)
    T = lambda w: jnp.transpose(w, (0, 2, 1))

    wa1_t = jnp.zeros((k, Hh, dp), jnp.float32).at[:, :hidden_dim, :dim_1].set(T(params["wa1"]))
    w2_t = jnp.zeros((k, dp, Hh), jnp.float32).at[:, dim_1:dim, :hidden_dim].set(T(params["w2"]))
    b2_t = jnp.zeros((k, dp, 1), jnp.float32).at[:, dim_1:dim, 0].set(params["b2"][:, 0, :])
    wa3_t = jnp.zeros((k, Hh, dp), jnp.float32).at[:, :hidden_dim, dim_1:dim].set(T(params["wa3"]))
    w4_t = jnp.zeros((k, dp, Hh), jnp.float32).at[:, :dim_1, :hidden_dim].set(T(params["w4"]))
    b4_t = jnp.zeros((k, dp, 1), jnp.float32).at[:, :dim_1, 0].set(params["b4"][:, 0, :])

    return {
        "wa1_t": wa1_t, "w2_t": w2_t, "b2_t": b2_t,
        "wa3_t": wa3_t, "w4_t": w4_t, "b4_t": b4_t,
        "wb1": params["wb1"], "b1": params["b1"],
        "wb3": params["wb3"], "b3": params["b3"],
    }


@functools.partial(jax.jit, static_argnames=("k", "dim", "hidden_dim", "obser_dim"))
def realnvp_cond_compose_forward(prepped, proposal_samples, observations, time,
                                 *, k, dim, hidden_dim, obser_dim):
    B, P, D = proposal_samples.shape
    assert D == dim
    log_det = jnp.zeros((B, P), dtype=jnp.float32)
    if k == 0:
        return proposal_samples.astype(jnp.float32), log_det

    dp = _round_up(dim, 8)                 # packed state rows (sublane-aligned)
    Hh = _round_up(hidden_dim, 8)          # hidden rows (sublane-aligned only)

    # ---- particle tiling: particles sit on lanes; minimize padding, amortize step cost ----
    TM_MAX = 1024
    n_tiles = max(1, -(-P // TM_MAX))
    if B * n_tiles < 2 and P > 256:        # give v7x's second TensorCore work
        n_tiles = 2
    if n_tiles == 1:
        TM = _round_up(P, 8)               # single tile spans the full particle axis
    else:
        TM = _round_up(-(-P // n_tiles), 256)   # lane-dense, fills the 256-wide MXU
    Pp = TM * n_tiles

    # ---- lane-dense transposed state (B, dp, Pp): rows [:dim_1]=lower, [dim_1:dim]=upper ----
    x_t = jnp.transpose(proposal_samples.astype(jnp.float32), (0, 2, 1))     # (B, dim, P)
    x_p = jnp.pad(x_t, ((0, 0), (0, dp - dim), (0, Pp - P)))                 # (B, dp, Pp)

    # ---- per-batch observation projections (obs branch of each FCNN, tiny columns) ----
    obs_t = observations[time].astype(jnp.float32)                           # (B, obser_dim)
    c1 = jnp.einsum("bo,koh->bkh", obs_t, prepped["wb1"]) + prepped["b1"][None, :, 0, :]
    c3 = jnp.einsum("bo,koh->bkh", obs_t, prepped["wb3"]) + prepped["b3"][None, :, 0, :]
    c1 = jnp.pad(c1, ((0, 0), (0, 0), (0, Hh - hidden_dim)))[..., None]      # (B, k, Hh, 1)
    c3 = jnp.pad(c3, ((0, 0), (0, 0), (0, Hh - hidden_dim)))[..., None]

    x_spec = pl.BlockSpec((1, dp, TM), lambda b, j: (b, 0, j))
    c_spec = pl.BlockSpec((1, k, Hh, 1), lambda b, j: (b, 0, 0, 0))
    wa_spec = pl.BlockSpec((k, Hh, dp), lambda b, j: (0, 0, 0))
    wo_spec = pl.BlockSpec((k, dp, Hh), lambda b, j: (0, 0, 0))
    bias_spec = pl.BlockSpec((k, dp, 1), lambda b, j: (0, 0, 0))

    out_p = pl.pallas_call(
        _make_flow_kernel(k),
        out_shape=jax.ShapeDtypeStruct((B, dp, Pp), jnp.float32),
        grid_spec=pltpu.PrefetchScalarGridSpec(
            num_scalar_prefetch=0,
            grid=(B, Pp // TM),
            in_specs=[x_spec, c_spec, c_spec,
                      wa_spec, wo_spec, bias_spec,
                      wa_spec, wo_spec, bias_spec],
            out_specs=x_spec),
        input_output_aliases={0: 0},           # write the packed state in place
        compiler_params=pltpu.CompilerParams(
            dimension_semantics=("parallel", "parallel")),
    )(x_p, c1, c3,
      prepped["wa1_t"], prepped["w2_t"], prepped["b2_t"],
      prepped["wa3_t"], prepped["w4_t"], prepped["b4_t"])

    z = jnp.transpose(out_p[:, :dim, :P], (0, 2, 1))                         # (B, P, dim)
    return z, log_det


def _reference_forward(params, proposal_samples, observations, time,
                       *, k, dim, hidden_dim, obser_dim):
    """Pure-JAX reference mirroring the PyTorch module."""
    B, P, D = proposal_samples.shape
    dim_1 = dim - dim // 2
    x = proposal_samples.astype(jnp.float32)
    obs = jnp.broadcast_to(observations[time][:, None, :], (B, P, obser_dim)).astype(jnp.float32)
    log_det = jnp.zeros((B, P), jnp.float32)
    for kk in range(k):
        lower, upper = x[..., :dim_1], x[..., dim_1:]
        h1 = jnp.tanh(lower @ params["wa1"][kk] + obs @ params["wb1"][kk] + params["b1"][kk])
        upper = upper + h1 @ params["w2"][kk] + params["b2"][kk]
        h2 = jnp.tanh(upper @ params["wa3"][kk] + obs @ params["wb3"][kk] + params["b3"][kk])
        lower = lower + h2 @ params["w4"][kk] + params["b4"][kk]
        x = jnp.concatenate([lower, upper], axis=-1)
    return x, log_det


if __name__ == "__main__":
    # small shapes: batch=2, particles=64, dim=4, obser_dim=3, hidden=16, k=2 flows
    B, P, DIM, OBS_DIM, HID, K, T = 2, 64, 4, 3, 16, 2, 5
    key = jax.random.PRNGKey(0)
    kx, kobs, kp = jax.random.split(key, 3)

    proposal_samples = jax.random.normal(kx, (B, P, DIM), jnp.float32)
    observations = jax.random.normal(kobs, (T, B, OBS_DIM), jnp.float32)
    time = 1

    params = init_params(kp, K, DIM, HID, OBS_DIM)
    prepped = prepare_params(params, k=K, dim=DIM, hidden_dim=HID)   # one-time weight prep

    z, log_det = realnvp_cond_compose_forward(
        prepped, proposal_samples, observations, time,
        k=K, dim=DIM, hidden_dim=HID, obser_dim=OBS_DIM)
    z = jax.block_until_ready(z)
    log_det = jax.block_until_ready(log_det)

    z_ref, log_det_ref = _reference_forward(
        params, proposal_samples, observations, time,
        k=K, dim=DIM, hidden_dim=HID, obser_dim=OBS_DIM)

    assert z.shape == (B, P, DIM) and log_det.shape == (B, P)
    assert jnp.allclose(z, z_ref, atol=1e-5, rtol=1e-5)
    assert jnp.allclose(log_det, log_det_ref)
    print("KERNEL_OK")
</pallas_src>

<mosaic_0001>
module attributes {stable_mosaic.version = 11 : i64} {
  func.func @kernel(%arg0: i32, %arg1: i32, %arg2: memref<1x8x64xf32, #tpu.memory_space<vmem>>, %arg3: memref<1x2x16x1xf32, #tpu.memory_space<vmem>>, %arg4: memref<1x2x16x1xf32, #tpu.memory_space<vmem>>, %arg5: memref<2x16x8xf32, #tpu.memory_space<vmem>>, %arg6: memref<2x8x16xf32, #tpu.memory_space<vmem>>, %arg7: memref<2x8x1xf32, #tpu.memory_space<vmem>>, %arg8: memref<2x16x8xf32, #tpu.memory_space<vmem>>, %arg9: memref<2x8x16xf32, #tpu.memory_space<vmem>>, %arg10: memref<2x8x1xf32, #tpu.memory_space<vmem>>, %arg11: memref<1x8x64xf32, #tpu.memory_space<vmem>>) attributes {dimension_semantics = [#tpu.dimension_semantics<parallel>, #tpu.dimension_semantics<parallel>], iteration_bounds = array<i64: 2, 1>, scalar_prefetch = 0 : i64, scratch_operands = 0 : i64, tpu.core_type = #tpu.core_type<tc>, window_params = [{transform_indices = @transform_0, window_bounds = array<i64: 1, 8, 64>}, {transform_indices = @transform_1, window_bounds = array<i64: 1, 2, 16, 1>}, {transform_indices = @transform_2, window_bounds = array<i64: 1, 2, 16, 1>}, {pipeline_mode = #tpu.pipeline_mode<synchronous>, transform_indices = @transform_3, window_bounds = array<i64: 2, 16, 8>}, {pipeline_mode = #tpu.pipeline_mode<synchronous>, transform_indices = @transform_4, window_bounds = array<i64: 2, 8, 16>}, {pipeline_mode = #tpu.pipeline_mode<synchronous>, transform_indices = @transform_5, window_bounds = array<i64: 2, 8, 1>}, {pipeline_mode = #tpu.pipeline_mode<synchronous>, transform_indices = @transform_6, window_bounds = array<i64: 2, 16, 8>}, {pipeline_mode = #tpu.pipeline_mode<synchronous>, transform_indices = @transform_7, window_bounds = array<i64: 2, 8, 16>}, {pipeline_mode = #tpu.pipeline_mode<synchronous>, transform_indices = @transform_8, window_bounds = array<i64: 2, 8, 1>}, {transform_indices = @transform_9, window_bounds = array<i64: 1, 8, 64>}]} {
    %c0 = arith.constant 0 : index
    %c0_0 = arith.constant 0 : index
    %c0_1 = arith.constant 0 : index
    %0 = vector.load %arg2[%c0, %c0_0, %c0_1] : memref<1x8x64xf32, #tpu.memory_space<vmem>>, vector<1x8x64xf32>
    %1 = vector.shape_cast %0 : vector<1x8x64xf32> to vector<8x64xf32>
    %c0_2 = arith.constant 0 : index
    %c0_3 = arith.constant 0 : index
    %c0_4 = arith.constant 0 : index
    %c0_5 = arith.constant 0 : index
    %2 = vector.load %arg3[%c0_2, %c0_3, %c0_4, %c0_5] : memref<1x2x16x1xf32, #tpu.memory_space<vmem>>, vector<1x2x16x1xf32>
    %3 = vector.shape_cast %2 : vector<1x2x16x1xf32> to vector<2x16x1xf32>
    %c0_6 = arith.constant 0 : index
    %c0_7 = arith.constant 0 : index
    %c0_8 = arith.constant 0 : index
    %c0_9 = arith.constant 0 : index
    %4 = vector.load %arg4[%c0_6, %c0_7, %c0_8, %c0_9] : memref<1x2x16x1xf32, #tpu.memory_space<vmem>>, vector<1x2x16x1xf32>
    %5 = vector.shape_cast %4 : vector<1x2x16x1xf32> to vector<2x16x1xf32>
    %c0_10 = arith.constant 0 : index
    %c0_11 = arith.constant 0 : index
    %c0_12 = arith.constant 0 : index
    %6 = vector.load %arg5[%c0_10, %c0_11, %c0_12] : memref<2x16x8xf32, #tpu.memory_space<vmem>>, vector<1x16x8xf32>
    %7 = vector.shape_cast %6 : vector<1x16x8xf32> to vector<16x8xf32>
    %cst = arith.constant dense<0.000000e+00> : vector<16x64xf32>
    %8 = tpu.matmul %7, %1, %cst {dimension_numbers = #tpu.dot_dimension_numbers<[1], [0], [0], [1], [0, 0, 1, 1], [], []>} : vector<16x8xf32>, vector<8x64xf32>, vector<16x64xf32> -> vector<16x64xf32>
    %9 = vector.extract_strided_slice %3 {offsets = [0, 0, 0], sizes = [1, 16, 1], strides = [1, 1, 1]} : vector<2x16x1xf32> to vector<1x16x1xf32>
    %10 = vector.shape_cast %9 : vector<1x16x1xf32> to vector<16x1xf32>
    %11 = vector.broadcast %10 : vector<16x1xf32> to vector<16x64xf32>
    %12 = arith.addf %8, %11 : vector<16x64xf32>
    %13 = math.tanh %12 : vector<16x64xf32>
    %c0_13 = arith.constant 0 : index
    %c0_14 = arith.constant 0 : index
    %c0_15 = arith.constant 0 : index
    %14 = vector.load %arg6[%c0_13, %c0_14, %c0_15] : memref<2x8x16xf32, #tpu.memory_space<vmem>>, vector<1x8x16xf32>
    %15 = vector.shape_cast %14 : vector<1x8x16xf32> to vector<8x16xf32>
    %cst_16 = arith.constant dense<0.000000e+00> : vector<8x64xf32>
    %16 = tpu.matmul %15, %13, %cst_16 {dimension_numbers = #tpu.dot_dimension_numbers<[1], [0], [0], [1], [0, 0, 1, 1], [], []>} : vector<8x16xf32>, vector<16x64xf32>, vector<8x64xf32> -> vector<8x64xf32>
    %17 = arith.addf %1, %16 : vector<8x64xf32>
    %c0_17 = arith.constant 0 : index
    %c0_18 = arith.constant 0 : index
    %c0_19 = arith.constant 0 : index
    %18 = vector.load %arg7[%c0_17, %c0_18, %c0_19] : memref<2x8x1xf32, #tpu.memory_space<vmem>>, vector<1x8x1xf32>
    %19 = vector.shape_cast %18 : vector<1x8x1xf32> to vector<8x1xf32>
    %20 = vector.broadcast %19 : vector<8x1xf32> to vector<8x64xf32>
    %21 = arith.addf %17, %20 : vector<8x64xf32>
    %c0_20 = arith.constant 0 : index
    %c0_21 = arith.constant 0 : index
    %c0_22 = arith.constant 0 : index
    %22 = vector.load %arg8[%c0_20, %c0_21, %c0_22] : memref<2x16x8xf32, #tpu.memory_space<vmem>>, vector<1x16x8xf32>
    %23 = vector.shape_cast %22 : vector<1x16x8xf32> to vector<16x8xf32>
    %cst_23 = arith.constant dense<0.000000e+00> : vector<16x64xf32>
    %24 = tpu.matmul %23, %21, %cst_23 {dimension_numbers = #tpu.dot_dimension_numbers<[1], [0], [0], [1], [0, 0, 1, 1], [], []>} : vector<16x8xf32>, vector<8x64xf32>, vector<16x64xf32> -> vector<16x64xf32>
    %25 = vector.extract_strided_slice %5 {offsets = [0, 0, 0], sizes = [1, 16, 1], strides = [1, 1, 1]} : vector<2x16x1xf32> to vector<1x16x1xf32>
    %26 = vector.shape_cast %25 : vector<1x16x1xf32> to vector<16x1xf32>
    %27 = vector.broadcast %26 : vector<16x1xf32> to vector<16x64xf32>
    %28 = arith.addf %24, %27 : vector<16x64xf32>
    %29 = math.tanh %28 : vector<16x64xf32>
    %c0_24 = arith.constant 0 : index
    %c0_25 = arith.constant 0 : index
    %c0_26 = arith.constant 0 : index
    %30 = vector.load %arg9[%c0_24, %c0_25, %c0_26] : memref<2x8x16xf32, #tpu.memory_space<vmem>>, vector<1x8x16xf32>
    %31 = vector.shape_cast %30 : vector<1x8x16xf32> to vector<8x16xf32>
    %cst_27 = arith.constant dense<0.000000e+00> : vector<8x64xf32>
    %32 = tpu.matmul %31, %29, %cst_27 {dimension_numbers = #tpu.dot_dimension_numbers<[1], [0], [0], [1], [0, 0, 1, 1], [], []>} : vector<8x16xf32>, vector<16x64xf32>, vector<8x64xf32> -> vector<8x64xf32>
    %33 = arith.addf %21, %32 : vector<8x64xf32>
    %c0_28 = arith.constant 0 : index
    %c0_29 = arith.constant 0 : index
    %c0_30 = arith.constant 0 : index
    %34 = vector.load %arg10[%c0_28, %c0_29, %c0_30] : memref<2x8x1xf32, #tpu.memory_space<vmem>>, vector<1x8x1xf32>
    %35 = vector.shape_cast %34 : vector<1x8x1xf32> to vector<8x1xf32>
    %36 = vector.broadcast %35 : vector<8x1xf32> to vector<8x64xf32>
    %37 = arith.addf %33, %36 : vector<8x64xf32>
    %c1 = arith.constant 1 : index
    %c0_31 = arith.constant 0 : index
    %c0_32 = arith.constant 0 : index
    %38 = vector.load %arg5[%c1, %c0_31, %c0_32] : memref<2x16x8xf32, #tpu.memory_space<vmem>>, vector<1x16x8xf32>
    %39 = vector.shape_cast %38 : vector<1x16x8xf32> to vector<16x8xf32>
    %cst_33 = arith.constant dense<0.000000e+00> : vector<16x64xf32>
    %40 = tpu.matmul %39, %37, %cst_33 {dimension_numbers = #tpu.dot_dimension_numbers<[1], [0], [0], [1], [0, 0, 1, 1], [], []>} : vector<16x8xf32>, vector<8x64xf32>, vector<16x64xf32> -> vector<16x64xf32>
    %41 = vector.extract_strided_slice %3 {offsets = [1, 0, 0], sizes = [1, 16, 1], strides = [1, 1, 1]} : vector<2x16x1xf32> to vector<1x16x1xf32>
    %42 = vector.shape_cast %41 : vector<1x16x1xf32> to vector<16x1xf32>
    %43 = vector.broadcast %42 : vector<16x1xf32> to vector<16x64xf32>
    %44 = arith.addf %40, %43 : vector<16x64xf32>
    %45 = math.tanh %44 : vector<16x64xf32>
    %c1_34 = arith.constant 1 : index
    %c0_35 = arith.constant 0 : index
    %c0_36 = arith.constant 0 : index
    %46 = vector.load %arg6[%c1_34, %c0_35, %c0_36] : memref<2x8x16xf32, #tpu.memory_space<vmem>>, vector<1x8x16xf32>
    %47 = vector.shape_cast %46 : vector<1x8x16xf32> to vector<8x16xf32>
    %cst_37 = arith.constant dense<0.000000e+00> : vector<8x64xf32>
    %48 = tpu.matmul %47, %45, %cst_37 {dimension_numbers = #tpu.dot_dimension_numbers<[1], [0], [0], [1], [0, 0, 1, 1], [], []>} : vector<8x16xf32>, vector<16x64xf32>, vector<8x64xf32> -> vector<8x64xf32>
    %49 = arith.addf %37, %48 : vector<8x64xf32>
    %c1_38 = arith.constant 1 : index
    %c0_39 = arith.constant 0 : index
    %c0_40 = arith.constant 0 : index
    %50 = vector.load %arg7[%c1_38, %c0_39, %c0_40] : memref<2x8x1xf32, #tpu.memory_space<vmem>>, vector<1x8x1xf32>
    %51 = vector.shape_cast %50 : vector<1x8x1xf32> to vector<8x1xf32>
    %52 = vector.broadcast %51 : vector<8x1xf32> to vector<8x64xf32>
    %53 = arith.addf %49, %52 : vector<8x64xf32>
    %c1_41 = arith.constant 1 : index
    %c0_42 = arith.constant 0 : index
    %c0_43 = arith.constant 0 : index
    %54 = vector.load %arg8[%c1_41, %c0_42, %c0_43] : memref<2x16x8xf32, #tpu.memory_space<vmem>>, vector<1x16x8xf32>
    %55 = vector.shape_cast %54 : vector<1x16x8xf32> to vector<16x8xf32>
    %cst_44 = arith.constant dense<0.000000e+00> : vector<16x64xf32>
    %56 = tpu.matmul %55, %53, %cst_44 {dimension_numbers = #tpu.dot_dimension_numbers<[1], [0], [0], [1], [0, 0, 1, 1], [], []>} : vector<16x8xf32>, vector<8x64xf32>, vector<16x64xf32> -> vector<16x64xf32>
    %57 = vector.extract_strided_slice %5 {offsets = [1, 0, 0], sizes = [1, 16, 1], strides = [1, 1, 1]} : vector<2x16x1xf32> to vector<1x16x1xf32>
    %58 = vector.shape_cast %57 : vector<1x16x1xf32> to vector<16x1xf32>
    %59 = vector.broadcast %58 : vector<16x1xf32> to vector<16x64xf32>
    %60 = arith.addf %56, %59 : vector<16x64xf32>
    %61 = math.tanh %60 : vector<16x64xf32>
    %c1_45 = arith.constant 1 : index
    %c0_46 = arith.constant 0 : index
    %c0_47 = arith.constant 0 : index
    %62 = vector.load %arg9[%c1_45, %c0_46, %c0_47] : memref<2x8x16xf32, #tpu.memory_space<vmem>>, vector<1x8x16xf32>
    %63 = vector.shape_cast %62 : vector<1x8x16xf32> to vector<8x16xf32>
    %cst_48 = arith.constant dense<0.000000e+00> : vector<8x64xf32>
    %64 = tpu.matmul %63, %61, %cst_48 {dimension_numbers = #tpu.dot_dimension_numbers<[1], [0], [0], [1], [0, 0, 1, 1], [], []>} : vector<8x16xf32>, vector<16x64xf32>, vector<8x64xf32> -> vector<8x64xf32>
    %65 = arith.addf %53, %64 : vector<8x64xf32>
    %c1_49 = arith.constant 1 : index
    %c0_50 = arith.constant 0 : index
    %c0_51 = arith.constant 0 : index
    %66 = vector.load %arg10[%c1_49, %c0_50, %c0_51] : memref<2x8x1xf32, #tpu.memory_space<vmem>>, vector<1x8x1xf32>
    %67 = vector.shape_cast %66 : vector<1x8x1xf32> to vector<8x1xf32>
    %68 = vector.broadcast %67 : vector<8x1xf32> to vector<8x64xf32>
    %69 = arith.addf %65, %68 : vector<8x64xf32>
    %c0_52 = arith.constant 0 : index
    %c0_53 = arith.constant 0 : index
    %c0_54 = arith.constant 0 : index
    %70 = vector.load %arg11[%c0_52, %c0_53, %c0_54] : memref<1x8x64xf32, #tpu.memory_space<vmem>>, vector<1x8x64xf32>
    %71 = vector.shape_cast %70 : vector<1x8x64xf32> to vector<8x64xf32>
    %72 = vector.shape_cast %69 : vector<8x64xf32> to vector<1x8x64xf32>
    tpu.vector_store %arg11[%c0_52, %c0_53, %c0_54], %72 {strides = array<i32>} : memref<1x8x64xf32, #tpu.memory_space<vmem>>, vector<1x8x64xf32>,
    return
  }
  func.func @transform_0(%arg0: i32, %arg1: i32) -> (i32, i32, i32) {
    %c0_i32 = arith.constant 0 : i32
    %c0_i32_0 = arith.constant 0 : i32
    return %arg0, %c0_i32, %arg1 : i32, i32, i32
  }
  func.func @transform_1(%arg0: i32, %arg1: i32) -> (i32, i32, i32, i32) {
    %c0_i32 = arith.constant 0 : i32
    %c0_i32_0 = arith.constant 0 : i32
    %c0_i32_1 = arith.constant 0 : i32
    %c0_i32_2 = arith.constant 0 : i32
    return %arg0, %c0_i32, %c0_i32_0, %c0_i32_1 : i32, i32, i32, i32
  }
  func.func @transform_2(%arg0: i32, %arg1: i32) -> (i32, i32, i32, i32) {
    %c0_i32 = arith.constant 0 : i32
    %c0_i32_0 = arith.constant 0 : i32
    %c0_i32_1 = arith.constant 0 : i32
    %c0_i32_2 = arith.constant 0 : i32
    return %arg0, %c0_i32, %c0_i32_0, %c0_i32_1 : i32, i32, i32, i32
  }
  func.func @transform_3(%arg0: i32, %arg1: i32) -> (i32, i32, i32) {
    %c0_i32 = arith.constant 0 : i32
    %c0_i32_0 = arith.constant 0 : i32
    %c0_i32_1 = arith.constant 0 : i32
    %c0_i32_2 = arith.constant 0 : i32
    return %c0_i32, %c0_i32_0, %c0_i32_1 : i32, i32, i32
  }
  func.func @transform_4(%arg0: i32, %arg1: i32) -> (i32, i32, i32) {
    %c0_i32 = arith.constant 0 : i32
    %c0_i32_0 = arith.constant 0 : i32
    %c0_i32_1 = arith.constant 0 : i32
    %c0_i32_2 = arith.constant 0 : i32
    return %c0_i32, %c0_i32_0, %c0_i32_1 : i32, i32, i32
  }
  func.func @transform_5(%arg0: i32, %arg1: i32) -> (i32, i32, i32) {
    %c0_i32 = arith.constant 0 : i32
    %c0_i32_0 = arith.constant 0 : i32
    %c0_i32_1 = arith.constant 0 : i32
    %c0_i32_2 = arith.constant 0 : i32
    return %c0_i32, %c0_i32_0, %c0_i32_1 : i32, i32, i32
  }
  func.func @transform_6(%arg0: i32, %arg1: i32) -> (i32, i32, i32) {
    %c0_i32 = arith.constant 0 : i32
    %c0_i32_0 = arith.constant 0 : i32
    %c0_i32_1 = arith.constant 0 : i32
    %c0_i32_2 = arith.constant 0 : i32
    return %c0_i32, %c0_i32_0, %c0_i32_1 : i32, i32, i32
  }
  func.func @transform_7(%arg0: i32, %arg1: i32) -> (i32, i32, i32) {
    %c0_i32 = arith.constant 0 : i32
    %c0_i32_0 = arith.constant 0 : i32
    %c0_i32_1 = arith.constant 0 : i32
    %c0_i32_2 = arith.constant 0 : i32
    return %c0_i32, %c0_i32_0, %c0_i32_1 : i32, i32, i32
  }
  func.func @transform_8(%arg0: i32, %arg1: i32) -> (i32, i32, i32) {
    %c0_i32 = arith.constant 0 : i32
    %c0_i32_0 = arith.constant 0 : i32
    %c0_i32_1 = arith.constant 0 : i32
    %c0_i32_2 = arith.constant 0 : i32
    return %c0_i32, %c0_i32_0, %c0_i32_1 : i32, i32, i32
  }
  func.func @transform_9(%arg0: i32, %arg1: i32) -> (i32, i32, i32) {
    %c0_i32 = arith.constant 0 : i32
    %c0_i32_0 = arith.constant 0 : i32
    return %arg0, %c0_i32, %arg1 : i32, i32, i32
  }
}

</mosaic_0001>

<bundles_post_ra>
// kernel: realnvp_cond_compose_forward.1
= control target key start
LH: loop header
LB: loop body
LE: loop exit
PB: predicated region body
PF: predicated region fallthrough
CT: control target
= control target key end

     0   :  { %s1467_s30 = smov 0   ;;  %s1469_s10 = smov 0   ;;  %s1586_s0 = inlined_call_operand.vmem [shape: f32[2,8,64], index: 0, kind: input, shape index: {}, may-alias: {0,9}]   ;;  %s1587_s1 = inlined_call_operand.vmem [shape: f32[2,2,16,1], index: 1, kind: input, shape index: {}]   ;;  %s1588_s2 = inlined_call_operand.vmem [shape: f32[2,2,16,1], index: 2, kind: input, shape index: {}]   ;;  %s1589_s3 = inlined_call_operand.vmem [shape: f32[2,16,8], index: 3, kind: input, shape index: {}]   ;;  %s1590_s4 = inlined_call_operand.vmem [shape: f32[2,8,16], index: 4, kind: input, shape index: {}]   ;;  %s1591_s5 = inlined_call_operand.vmem [shape: f32[2,8,1], index: 5, kind: input, shape index: {}]   ;;  %s1592_s6 = inlined_call_operand.vmem [shape: f32[2,16,8], index: 6, kind: input, shape index: {}]   ;;  %s1593_s7 = inlined_call_operand.vmem [shape: f32[2,8,16], index: 7, kind: input, shape index: {}]   ;;  %s1594_s8 = inlined_call_operand.vmem [shape: f32[2,8,1], index: 8, kind: input, shape index: {}]   ;;  %s1595_s9 = inlined_call_operand.vmem [shape: f32[2,8,64], index: 9, kind: output, shape index: {}, may-alias: {0,9}]  }
   0x1   :  { %s1471_s11 = smov 0  }
   0x2 LB: > { %s31_s12 = sadd.s32 1, %s1407_s10  ;;  %p1228_p0 = scmp.ge.s32.totalorder %s1411_s11, 1  ;;  %s1411_s11 = sphi %s1471_s11, %s19_s11   ;;  %s1407_s10 = sphi %s1469_s10, %s1597_s10   ;;  %s1403_s30 = sphi %s1467_s30, %s1596_s30  }
   0x3   : > { %p33_p1 = scmp.ge.s32.totalorder %s31_s12, 2  ;;  %p325_p2 = scmp.lt.s32.totalorder %s1411_s11, 3 }
   0x5   : > { %s1599_s12 = smov (%p33_p1, %s31_s12), 0  ;;  %p326_p3 = pnand %p1228_p0, %p325_p2 }
   0x6   : > { %p375_p4 = scmp.lt.s32.totalorder (!%p326_p3), %s1403_s30, 1  ;;  %v408_v0 = vld [vmem:[%s1589_s3] sm:$0xff] (!%p326_p3)  ;;  %vm420_vm0 = vcmask (!%p326_p3), 64512   ;;  %v1413_v1 = vmov (!%p326_p3), 0   ;;  %v409_v3 = vld [vmem:[%s1589_s3 + $0x8] sm:$0xff] (!%p326_p3)  ;;  %v1414_v10 = vmov (!%p326_p3), 0.0|0.0  }
   0x7   : > { %329 = sbr.rel (%p326_p3) target bundleno = 1815 (0x717), region = 56  ;;  %1285 = vmatprep.mubr.msk.f32.mxu0 (!%p326_p3), %vm420_vm0, %v408_v0  ;;  %1371 = vset.pattern.permute.xlu0 (!%p326_p3), %v1413_v1  ;;  %v1247_v8 = vld [vmem:[%s1591_s5 + $0x8] sm:$0xff] (!%p326_p3)  ;;  %vm1415_vm1 = vmmov (!%p326_p3), 0   ;;  %v1416_v11 = vmov (!%p326_p3), 0.0   ;;  %v580_v12 = vld [vmem:[%s1591_s5] sm:$0xff] (!%p326_p3)  ;;  %vm505_vm2 = vcmask (!%p326_p3), 130048  }
   0x8   : > { %1372 = vset.pattern.permute.xlu1 (!%p326_p3), %v1413_v1  ;;  %1331 = vmatprep.subr.bf16.mxu1 (!%p326_p3), %v1414_v10  ;;  %v757_v14 = vld [vmem:[%s1594_s8] sm:$0xff] (!%p326_p3)  ;;  %v1254_v17 = vld [vmem:[%s1594_s8 + $0x8] sm:$0xff] (!%p326_p3)  ;;  %v1241_v45 = vld [vmem:[%s1589_s3 + $0x10] sm:$0xff] (!%p326_p3)  ;;  %vm1124_vm3 = vcmask (!%p326_p3), 523264  }
   0x9   : > { %1292 = vmatprep.mubr.msk.f32.mxu1 (!%p326_p3), %vm1415_vm1, %v1416_v11  ;;  %583 = vperm.xlu1 (!%p326_p3), %1372, %v580_v12   ;;  %v504_v27 = vld [vmem:[%s1590_s4] sm:$0xff] (!%p326_p3)  ;;  %v588_v34 = vld [vmem:[%s1592_s6 + $0x8] sm:$0xff] (!%p326_p3)  ;;  %v1242_v51 = vld [vmem:[%s1589_s3 + $0x18] sm:$0xff] (!%p326_p3) }
   0xa   : > { %v587_v28 = vld [vmem:[%s1592_s6] sm:$0xff] (!%p326_p3)  ;;  %v1245_v61 = vld [vmem:[%s1590_s4 + $0x8] sm:$0xff] (!%p326_p3)  ;;  %v1248_v62 = vld [vmem:[%s1592_s6 + $0x10] sm:$0xff] (!%p326_p3) }
   0xb   : > { %v682_v44 = vld [vmem:[%s1593_s7] sm:$0xff] (!%p326_p3) }
   0xe   : > { %s1601_s30 = smov (!%p375_p4, %s1403_s30), 1 }
   0xf   : > { %s1229_s15 = sshll.u32 %s1601_s30, 3  ;;  %s1257_s16 = sshll.u32 %s1601_s30, 5 }
  0x10   : > { %s381_s19 = scalar_lea.vmem %s1586_s0, %s1229_s15  ;;  %s386_s24 = scalar_lea.vmem %s1587_s1, %s1257_s16 }
  0x11   : > { %v399_v2 = vld [vmem:[%s381_s19] sm:$0xff]  ;;  %v401_v5 = vld [vmem:[%s386_s24 + $0x8] sm:$0xff]  ;;  %s391_s27 = scalar_lea.vmem %s1588_s2, %s1257_s16  ;;  %v402_v7 = vld [vmem:[%s386_s24 + $0x10] sm:$0xff]  ;;  %s398_s26 = scalar_lea.vmem %s1595_s9, %s1229_s15 }
  0x12   : > { %1283 = vmatprep.subr.mxu0 %v399_v2  ;;  %v400_v4 = vld [vmem:[%s386_s24] sm:$0xff]  ;;  %v405_v6 = vld [vmem:[%s391_s27 + $0x8] sm:$0xff]  ;;  %v407_v9 = vld [vmem:[%s391_s27 + $0x18] sm:$0xff] }
  0x13   : > { %1284 = vmatpush3.msra.mxu0 %v399_v2  ;;  %412 = vperm.xlu0 %1371, %v400_v4   ;;  %v404_v13 = vld [vmem:[%s391_s27] sm:$0xff]  ;;  %v403_v15 = vld [vmem:[%s386_s24 + $0x18] sm:$0xff]  ;;  %v406_v16 = vld [vmem:[%s391_s27 + $0x10] sm:$0xff] }
  0x14   : > { %1286 = vmatmul.mubr.msk.f32.vlgmr.msra.gmra.mrb[0].mxu0 %vm420_vm0, %v409_v3  ;;  %591 = vperm.xlu1 %1372, %v404_v13   ;;  %v1249_v4 = vld [vmem:[%s1592_s6 + $0x18] sm:$0xff] }
  0x15   : > { %1297 = vmatprep.mubr.msk.f32.mxu0 %vm420_vm0, %v587_v28 }
  0x17   : > { %417 = vperm.xlu0 %1371, %v401_v5  }
  0x18   : > { %760 = vperm.xlu1 %1372, %v757_v14   ;;  %v1252_v14 = vld [vmem:[%s1593_s7 + $0x8] sm:$0xff] }
  0x1b   : > { %596 = vperm.xlu0 %1371, %v405_v6  }
  0x1c   : > { %774 = vperm.xlu1 %1372, %v403_v15  }
  0x1f   : > { %769 = vperm.xlu0 %1371, %v402_v7  }
  0x20   : > { %949 = vperm.xlu1 %1372, %v406_v16  }
  0x23   : > { %940 = vperm.xlu0 %1371, %v1247_v8  }
  0x24   : > { %1120 = vperm.xlu1 %1372, %v1254_v17  }
  0x27   : > { %954 = vperm.xlu0 %1371, %v407_v9  }
  0x88   : > { %v584_v32 = vpop.permute.xlu1 %583 }
  0x92   : > { %v413_v18 = vpop.permute.xlu0 %412 }
  0x93   : > { %v592_v37 = vpop.permute.xlu1 %591 }
  0x96   : > { %v418_v19 = vpop.permute.xlu0 %417 }
  0x97   : > { %v761_v49 = vpop.permute.xlu1 %760 }
  0x9a   : > { %v597_v35 = vpop.permute.xlu0 %596 }
  0x9b   : > { %v775_v52 = vpop.permute.xlu1 %774 }
  0x9e   : > { %v770_v54 = vpop.permute.xlu0 %769 }
  0x9f   : > { %v950_v7 = vpop.permute.xlu1 %949 }
  0xe7   : > { %v1287_v20 = vpop.f32.mrb[0].mxu0 }
  0xe8   : > { %v499_v21 = vadd.f32 %v1287_v20, %v418_v19  ;;  %v493_v22 = vpop.f32.mrb[1].mxu0 }
  0xe9   : > { %v494_v23 = vadd.f32 %v493_v22, %v413_v18  ;;  %v1121_v18 = vpop.permute.xlu1 %1120 }
  0xea   : > { %1373 = vtanh.f32 %v499_v21 }
  0xeb   : > { %1375 = vtanh.f32 %v494_v23 }
  0xf4   : > { %v1374_v24 = vpop.eup %1373 }
  0xf5   : > { %v1376_v25 = vpop.eup %1375 }
  0xf6   : > { %v1332_v26 = vpack.c.bf16 %v1374_v24, %v1376_v25 }
  0xf8   : > { %1333 = vmatpush3.bf16.msra.mxu1 %v1332_v26 }
  0xf9   : > { %1334 = vmatprep.subr.bf16.mxu1 %v1414_v10 }
  0xfb   : > { %1293 = vmatmul.mubr.msk.f32.vlgmr.msra.gmra.mrb[0].mxu1 %vm505_vm2, %v504_v27 }
  0xfc   : > { %1304 = vmatprep.mubr.msk.f32.mxu1 %vm1415_vm1, %v1416_v11 }
 0x1ce   : > { %v575_v29 = vpop.f32.mrb[0].mxu1 }
 0x1cf   : > { %v579_v30 = vadd.f32 %v575_v29, %v399_v2  ;;  %v1294_v31 = vpop.f32.mrb[1].mxu1  ;;  %v941_v2 = vpop.permute.xlu0 %940 }
 0x1d1   : > { %v586_v33 = vadd.f32 %v584_v32, %v579_v30 }
 0x1d3   : > { %1295 = vmatprep.subr.mxu0 %v586_v33  ;;  %v955_v5 = vpop.permute.xlu0 %954 }
 0x1d4   : > { %1296 = vmatpush3.msra.mxu0 %v586_v33 }
 0x1d5   : > { %1298 = vmatmul.mubr.msk.f32.vlgmr.msra.gmra.mrb[2].mxu0 %vm420_vm0, %v588_v34 }
 0x1d6   : > { %1309 = vmatprep.mubr.msk.f32.mxu0 %vm420_vm0, %v1241_v45 }
 0x2a8   : > { %v1299_v36 = vpop.f32.mrb[2].mxu0 }
 0x2a9   : > { %v677_v38 = vadd.f32 %v1299_v36, %v597_v35  ;;  %v671_v39 = vpop.f32.mrb[3].mxu0 }
 0x2aa   : > { %v672_v40 = vadd.f32 %v671_v39, %v592_v37 }
 0x2ab   : > { %1377 = vtanh.f32 %v677_v38 }
 0x2ac   : > { %1379 = vtanh.f32 %v672_v40 }
 0x2b5   : > { %v1378_v41 = vpop.eup %1377 }
 0x2b6   : > { %v1380_v42 = vpop.eup %1379 }
 0x2b7   : > { %v1335_v43 = vpack.c.bf16 %v1378_v41, %v1380_v42 }
 0x2b9   : > { %1336 = vmatpush3.bf16.msra.mxu1 %v1335_v43 }
 0x2ba   : > { %1337 = vmatprep.subr.bf16.mxu1 %v1414_v10 }
 0x2bc   : > { %1305 = vmatmul.mubr.msk.f32.vlgmr.msra.gmra.mrb[2].mxu1 %vm505_vm2, %v682_v44 }
 0x2bd   : > { %1316 = vmatprep.mubr.msk.f32.mxu1 %vm1415_vm1, %v1416_v11 }
 0x38f   : > { %v752_v46 = vpop.f32.mrb[2].mxu1 }
 0x390   : > { %v756_v47 = vadd.f32 %v752_v46, %v586_v33  ;;  %v1306_v48 = vpop.f32.mrb[3].mxu1 }
 0x392   : > { %v763_v50 = vadd.f32 %v761_v49, %v756_v47 }
 0x394   : > { %1307 = vmatprep.subr.mxu0 %v763_v50 }
 0x395   : > { %1308 = vmatpush3.msra.mxu0 %v763_v50 }
 0x396   : > { %1310 = vmatmul.mubr.msk.f32.vlgmr.msra.gmra.mrb[4].mxu0 %vm420_vm0, %v1242_v51 }
 0x397   : > { %1321 = vmatprep.mubr.msk.f32.mxu0 %vm420_vm0, %v1248_v62 }
 0x469   : > { %v1311_v53 = vpop.f32.mrb[4].mxu0 }
 0x46a   : > { %v855_v55 = vadd.f32 %v1311_v53, %v775_v52  ;;  %v849_v56 = vpop.f32.mrb[5].mxu0 }
 0x46b   : > { %v850_v57 = vadd.f32 %v849_v56, %v770_v54 }
 0x46c   : > { %1381 = vtanh.f32 %v855_v55 }
 0x46d   : > { %1383 = vtanh.f32 %v850_v57 }
 0x476   : > { %v1382_v58 = vpop.eup %1381 }
 0x477   : > { %v1384_v59 = vpop.eup %1383 }
 0x478   : > { %v1338_v60 = vpack.c.bf16 %v1382_v58, %v1384_v59 }
 0x47a   : > { %1339 = vmatpush3.bf16.msra.mxu1 %v1338_v60 }
 0x47b   : > { %1340 = vmatprep.subr.bf16.mxu1 %v1414_v10 }
 0x47d   : > { %1317 = vmatmul.mubr.msk.f32.vlgmr.msra.gmra.mrb[4].mxu1 %vm505_vm2, %v1245_v61 }
 0x47e   : > { %1328 = vmatprep.mubr.msk.f32.mxu1 %vm1415_vm1, %v1416_v11 }
 0x550   : > { %v931_v63 = vpop.f32.mrb[4].mxu1 }
 0x551   : > { %v935_v0 = vadd.f32 %v931_v63, %v763_v50  ;;  %v1318_v1 = vpop.f32.mrb[5].mxu1 }
 0x553   : > { %v943_v3 = vadd.f32 %v941_v2, %v935_v0 }
 0x555   : > { %1319 = vmatprep.subr.mxu0 %v943_v3 }
 0x556   : > { %1320 = vmatpush3.msra.mxu0 %v943_v3 }
 0x557   : > { %1322 = vmatmul.mubr.msk.f32.vlgmr.msra.gmra.mrb[6].mxu0 %vm420_vm0, %v1249_v4 }
 0x62a   : > { %v1323_v6 = vpop.f32.mrb[6].mxu0 }
 0x62b   : > { %v1035_v8 = vadd.f32 %v1323_v6, %v955_v5  ;;  %v1029_v9 = vpop.f32.mrb[7].mxu0 }
 0x62c   : > { %v1030_v10 = vadd.f32 %v1029_v9, %v950_v7 }
 0x62d   : > { %1385 = vtanh.f32 %v1035_v8 }
 0x62e   : > { %1387 = vtanh.f32 %v1030_v10 }
 0x637   : > { %v1386_v11 = vpop.eup %1385 }
 0x638   : > { %v1388_v12 = vpop.eup %1387 }
 0x639   : > { %v1341_v13 = vpack.c.bf16 %v1386_v11, %v1388_v12 }
 0x63b   : > { %1342 = vmatpush3.bf16.msra.mxu1 %v1341_v13 }
 0x63e   : > { %1329 = vmatmul.mubr.msk.f32.vlgmr.msra.gmra.mrb[6].mxu1 %vm505_vm2, %v1252_v14 }
 0x711   : > { %v1111_v15 = vpop.f32.mrb[6].mxu1 }
 0x712   : > { %v1115_v16 = vadd.f32 %v1111_v15, %v943_v3  ;;  %v1330_v17 = vpop.f32.mrb[7].mxu1 }
 0x714   : > { %v1123_v19 = vadd.f32 %v1121_v18, %v1115_v16 }
 0x716   : > { %1125 = vst.msk [vmem:[%s398_s26] sm:$0xff] %vm1124_vm3, %v1123_v19 }
 0x717 PF: > { %s19_s11 = sadd.s32 1, %s1411_s11   ;;  %s1596_s30 = smov %s1407_s10 }
 0x718   : > { %p16_p5 = scmp.ge.s32.totalorder %s19_s11, 4   ;;  %s1597_s10 = smov %s1599_s12 }
 0x71a   :  { %18 = sbr.rel (!%p16_p5) target bundleno = 2 (0x2), region = 98 }

</bundles_post_ra>
